<compile_context>
chip_gen: v7x
topology: tpu7x:2x2x1
jax: 0.10.0
libtpu: 0.0.40
codegen_flags: <defaults>
</compile_context>

<pallas_src>
import math
import functools

import jax
import jax.numpy as jnp
from jax.experimental import pallas as pl
from jax.experimental.pallas import tpu as pltpu

NUM_CELLS = 16          # fixed in the PyTorch module
MAX_MEMORY_LEN = 2048   # fixed in the PyTorch module

# scores stay f32 end-to-end, so an f32-finfo-based mask value is safe
_MASK_VALUE = float(jnp.finfo(jnp.float32).min) / 2.0


# ----------------------------------------------------------------------------
# host-side helpers: per-generation VMEM budgets + static tile selection
# ----------------------------------------------------------------------------
def _cdiv(a, b):
    return (a + b - 1) // b


def _round_up(n, m):
    return ((n + m - 1) // m) * m


@functools.lru_cache(maxsize=None)
def _budgets():
    """Derive tile / VMEM budgets from the physical VMEM size."""
    cap = 64 << 20                              # conservative default (v7x)
    try:
        info = pltpu.get_tpu_info()
        for name in ("vmem_capacity_bytes", "vmem_size_bytes", "vmem_bytes"):
            v = getattr(info, name, None)
            if v:
                cap = int(v)
                break
    except Exception:
        pass
    big = cap >= (100 << 20)                    # v5e / v6e: 128 MiB physical
    return dict(
        vmem_limit=(100 << 20) if big else (56 << 20),
        # total bytes for all row-proportional buffers (h x2, out x2, scratch)
        row=(48 << 20) if big else (20 << 20),
        # total bytes for the K and V tiles including double-buffering
        mem=(24 << 20) if big else (10 << 20),
        # total bytes for one compressor column tile (w1/w2 dbuf + intermediate)
        col=(16 << 20) if big else (8 << 20),
        # v7x has 2 TensorCores; keep ns >= 2 so the 2nd core is not idle
        min_splits=1 if big else 2,
    )


def _row_tile(batch, seq, hidden, budget, min_splits=1):
    # crude per-row VMEM bill: h (x2 dbuf) + out (x2 dbuf) + ~2 blocks of scratch
    per_row = batch * hidden * 4 * 6
    target = max(8, (budget // max(1, per_row)) // 8 * 8)
    if min_splits > 1 and seq >= 8 * min_splits:
        target = min(target, max(8, _round_up(_cdiv(seq, min_splits), 8)))
    if seq <= target:
        return seq
    best = 0
    for t in range(8, target + 1, 8):           # prefer an exact divisor
        if seq % t == 0:
            best = t
    return best if best else target             # ragged tail: rows are independent


def _mem_tile(batch, mem_len, memory_dim, kv_bytes, budget):
    per_row = batch * memory_dim * kv_bytes * 2 * 2   # K + V, double-buffered
    target = max(8, (budget // max(1, per_row)) // 8 * 8)
    if mem_len <= target:
        return mem_len        # nm == 1: plain softmax, no online rescale
    return target


def _col_tile(n, target):
    # largest multiple-of-128 divisor of n (reduction axis must tile exactly)
    target = max(128, (target // 128) * 128)
    if n <= target:
        return n
    best = 0
    for t in range(128, target + 1, 128):
        if n % t == 0:
            best = t
    return best if best else n


# ----------------------------------------------------------------------------
# small in-kernel helpers
# ----------------------------------------------------------------------------
def _mm(x3, w):
    """[B,S,K] @ [K,N] on the MXU: bf16 operands, f32 accumulation."""
    b, s, k = x3.shape
    y = jnp.dot(x3.reshape(b * s, k).astype(jnp.bfloat16),
                w.astype(jnp.bfloat16),
                preferred_element_type=jnp.float32)
    return y.reshape(b, s, w.shape[1])


def _erf(x):
    # Abramowitz & Stegun 7.1.26 rational approximation (|err| < 1.5e-7);
    # exp/mul/add/select/reciprocal only (VPU + EUP friendly, f32 / v5e-safe).
    a1, a2, a3, a4, a5 = (0.254829592, -0.284496736, 1.421413741,
                          -1.453152027, 1.061405429)
    p = 0.3275911
    sgn = jnp.where(x >= 0.0, 1.0, -1.0)
    ax = jnp.abs(x)
    t = pl.reciprocal(1.0 + p * ax, approx=True)   # EUP slot
    poly = ((((a5 * t + a4) * t + a3) * t + a2) * t + a1) * t
    return sgn * (1.0 - poly * jnp.exp(-ax * ax))


def _gelu_exact(x):
    # matches torch.nn.GELU() (erf formulation)
    return 0.5 * x * (1.0 + _erf(x * (1.0 / math.sqrt(2.0))))


def _softmax_last(x):
    m = jnp.max(x, axis=-1, keepdims=True)
    e = jnp.exp(x - m)
    return e * pl.reciprocal(jnp.sum(e, axis=-1, keepdims=True), approx=True)


# ----------------------------------------------------------------------------
# fused kernel: router softmax + per-cell attention + gated residual
# grid = (seq_tiles, num_cells, mem_tiles)
# ----------------------------------------------------------------------------
def _attend_gate_kernel(h_ref, wr_ref, br_ref, wk_ref, bk_ref, k_ref, v_ref,
                        wo_ref, bo_ref, wgh_ref, wgm_ref, bg_ref,
                        out_ref, cw_sc, out_sc, *flash_sc,
                        scale, mem_len, m_tile, need_mask, single_mem_tile):
    c = pl.program_id(1)
    m = pl.program_id(2)
    nc = pl.num_programs(1)
    nm = pl.num_programs(2)

    # --- once per seq-tile: router softmax + zero the weighted-output acc ---
    @pl.when((c == 0) & (m == 0))
    def _():
        logits = _mm(h_ref[...], wr_ref[...]) + br_ref[...]
        cw_sc[...] = _softmax_last(logits)            # [B, ts, C], VMEM only
        out_sc[...] = jnp.zeros_like(out_sc)

    def project_query():
        # 1/sqrt(Md) folded into q; query fed to the MXU in bf16.
        q = (_mm(h_ref[...], wk_ref[0]) + bk_ref[0]) * scale
        return q.astype(jnp.bfloat16)

    def cell_epilogue(ctx):
        # project context, weight by this cell's router prob, accumulate.
        cell_out = _mm(ctx, wo_ref[0]) + bo_ref[0]    # [B, ts, H]
        n_cells = cw_sc.shape[-1]
        lane = jax.lax.broadcasted_iota(jnp.int32, (1, 1, n_cells), 2)
        cw_c = jnp.sum(cw_sc[...] * (lane == c).astype(jnp.float32),
                       axis=-1, keepdims=True)        # [B, ts, 1]
        out_sc[...] = out_sc[...] + cw_c * cell_out

    if single_mem_tile:
        # whole per-cell memory fits one tile: plain softmax, no flash rescale
        q = project_query()
        k = k_ref[0].astype(jnp.bfloat16)
        v = v_ref[0].astype(jnp.bfloat16)
        s = jnp.einsum('bqd,bkd->bqk', q, k,
                       preferred_element_type=jnp.float32)   # f32 scores
        p = _softmax_last(s)                                  # f32 exp (v5e-safe)
        ctx = jnp.einsum('bqk,bkd->bqd', p.astype(jnp.bfloat16), v,
                         preferred_element_type=jnp.float32)
        cell_epilogue(ctx)
    else:
        q_sc, m_sc, l_sc, acc_sc = flash_sc

        # --- once per cell: query projection + flash init --------------------
        @pl.when(m == 0)
        def _():
            q_sc[...] = project_query()
            m_sc[...] = jnp.full_like(m_sc, -jnp.inf)
            l_sc[...] = jnp.zeros_like(l_sc)
            acc_sc[...] = jnp.zeros_like(acc_sc)

        def flash_step(mask_tail):
            k = k_ref[0].astype(jnp.bfloat16)
            v = v_ref[0]
            s = jnp.einsum('bqd,bkd->bqk', q_sc[...], k,
                           preferred_element_type=jnp.float32)   # [B, ts, mt]
            if mask_tail:
                # ragged LAST memory tile only: kill padding columns, and zero
                # padding value rows so stale VMEM can never reach the acc.
                pos_s = m * m_tile + jax.lax.broadcasted_iota(jnp.int32, s.shape, 2)
                s = jnp.where(pos_s < mem_len, s, _MASK_VALUE)
                pos_v = m * m_tile + jax.lax.broadcasted_iota(jnp.int32, v.shape, 1)
                v = jnp.where(pos_v < mem_len, v, 0)
            m_new = jnp.maximum(m_sc[...], jnp.max(s, axis=-1, keepdims=True))
            alpha = jnp.exp(m_sc[...] - m_new)
            p = jnp.exp(s - m_new)
            l_sc[...] = alpha * l_sc[...] + jnp.sum(p, axis=-1, keepdims=True)
            acc_sc[...] = alpha * acc_sc[...] + jnp.einsum(
                'bqk,bkd->bqd', p.astype(jnp.bfloat16), v.astype(jnp.bfloat16),
                preferred_element_type=jnp.float32)
            m_sc[...] = m_new

        if need_mask:
            @pl.when(m == nm - 1)
            def _():
                flash_step(True)

            @pl.when(m < nm - 1)
            def _():
                flash_step(False)
        else:
            flash_step(False)

        # --- end of a cell: normalize + project + router-weight --------------
        @pl.when(m == nm - 1)
        def _():
            cell_epilogue(acc_sc[...] * pl.reciprocal(l_sc[...], approx=True))

    # --- epilogue: memory gate + residual, written once per seq-tile --------
    @pl.when((c == nc - 1) & (m == nm - 1))
    def _():
        h = h_ref[...]
        mo = out_sc[...]
        logit = (jnp.sum(h * wgh_ref[...], axis=-1, keepdims=True)
                 + jnp.sum(mo * wgm_ref[...], axis=-1, keepdims=True)
                 + bg_ref[...])
        out_ref[...] = h + jax.nn.sigmoid(logit) * mo


def attend_router_gate(h, params, keys, vals, mem_len, memory_dim):
    B, S, H = h.shape
    C = keys.shape[0]
    Md = memory_dim
    bud = _budgets()
    kv_bytes = jnp.dtype(keys.dtype).itemsize

    ts = _row_tile(B, S, H, bud['row'], bud['min_splits'])
    ns = _cdiv(S, ts)
    mt = _mem_tile(B, mem_len, Md, kv_bytes, bud['mem'])
    nm = _cdiv(mem_len, mt)
    single = (nm == 1)
    need_mask = (mem_len % mt) != 0     # only the last memory tile is ragged

    kernel = functools.partial(
        _attend_gate_kernel,
        scale=1.0 / math.sqrt(Md), mem_len=mem_len, m_tile=mt,
        need_mask=need_mask, single_mem_tile=single)

    scratch = [
        pltpu.VMEM((B, ts, C), jnp.float32),     # router cell weights
        pltpu.VMEM((B, ts, H), jnp.float32),     # weighted memory output
    ]
    if not single:
        scratch += [
            pltpu.VMEM((B, ts, Md), jnp.bfloat16),   # per-cell query (MXU input)
            pltpu.VMEM((B, ts, 1), jnp.float32),     # m_i
            pltpu.VMEM((B, ts, 1), jnp.float32),     # l_i
            pltpu.VMEM((B, ts, Md), jnp.float32),    # context accumulator
        ]

    return pl.pallas_call(
        kernel,
        out_shape=jax.ShapeDtypeStruct((B, S, H), jnp.float32),
        grid=(ns, C, nm),
        in_specs=[
            pl.BlockSpec((B, ts, H), lambda si, c, m: (0, si, 0)),        # h
            pl.BlockSpec((H, C), lambda si, c, m: (0, 0)),                # wr
            pl.BlockSpec((1, 1, C), lambda si, c, m: (0, 0, 0)),          # br
            pl.BlockSpec((1, H, Md), lambda si, c, m: (c, 0, 0)),         # wk
            pl.BlockSpec((1, 1, Md), lambda si, c, m: (c, 0, 0)),         # bk
            pl.BlockSpec((1, B, mt, Md), lambda si, c, m: (c, 0, m, 0)),  # keys
            pl.BlockSpec((1, B, mt, Md), lambda si, c, m: (c, 0, m, 0)),  # vals
            pl.BlockSpec((1, Md, H), lambda si, c, m: (c, 0, 0)),         # wo
            pl.BlockSpec((1, 1, H), lambda si, c, m: (c, 0, 0)),          # bo
            pl.BlockSpec((1, 1, H), lambda si, c, m: (0, 0, 0)),          # wg_h
            pl.BlockSpec((1, 1, H), lambda si, c, m: (0, 0, 0)),          # wg_m
            pl.BlockSpec((1, 1, 1), lambda si, c, m: (0, 0, 0)),          # bg
        ],
        out_specs=pl.BlockSpec((B, ts, H), lambda si, c, m: (0, si, 0)),
        scratch_shapes=scratch,
        compiler_params=pltpu.CompilerParams(
            dimension_semantics=("parallel", "arbitrary", "arbitrary"),
            vmem_limit_bytes=bud['vmem_limit']),
    )(h, params['wr'], params['br'], params['wk'], params['bk'],
      keys, vals, params['wo'], params['bo'],
      params['wg_h'], params['wg_m'], params['bg'])


# ----------------------------------------------------------------------------
# compressor MLP: row-tiled, 2H intermediate tiled as a reduction axis
# ----------------------------------------------------------------------------
def _compress_kernel(h_ref, w1_ref, b1_ref, w2_ref, b2_ref, out_ref, acc_sc):
    j = pl.program_id(1)
    nj = pl.num_programs(1)

    @pl.when(j == 0)
    def _():
        acc_sc[...] = jnp.zeros_like(acc_sc)

    x = _mm(h_ref[...], w1_ref[...]) + b1_ref[...]     # [B, ts, jt]
    x = _gelu_exact(x)                                  # f32 (v5e-safe)
    acc_sc[...] += _mm(x, w2_ref[...])                  # [B, ts, H]

    @pl.when(j == nj - 1)
    def _():
        out_ref[...] = acc_sc[...] + b2_ref[...]


def compress(h, w1, b1, w2, b2):
    B, S, H = h.shape
    H2 = w1.shape[1]
    bud = _budgets()
    ts = _row_tile(B, S, H, bud['row'], bud['min_splits'])
    ns = _cdiv(S, ts)
    # bytes per intermediate column: double-buffered bf16 w1/w2 columns/rows
    # plus the f32 intermediate slab
    per_col = 2 * 2 * (H * 2) + B * ts * 4
    jt = _col_tile(H2, max(128, bud['col'] // max(1, per_col)))
    nj = H2 // jt
    return pl.pallas_call(
        _compress_kernel,
        out_shape=jax.ShapeDtypeStruct((B, S, H), jnp.float32),
        grid=(ns, nj),
        in_specs=[
            pl.BlockSpec((B, ts, H), lambda i, j: (0, i, 0)),
            pl.BlockSpec((H, jt), lambda i, j: (0, j)),
            pl.BlockSpec((1, 1, jt), lambda i, j: (0, 0, j)),
            pl.BlockSpec((jt, H), lambda i, j: (j, 0)),
            pl.BlockSpec((1, 1, H), lambda i, j: (0, 0, 0)),
        ],
        out_specs=pl.BlockSpec((B, ts, H), lambda i, j: (0, i, 0)),
        scratch_shapes=[pltpu.VMEM((B, ts, H), jnp.float32)],
        compiler_params=pltpu.CompilerParams(
            dimension_semantics=("parallel", "arbitrary"),
            vmem_limit_bytes=bud['vmem_limit']),
    )(h, w1, b1, w2, b2)


# ----------------------------------------------------------------------------
# create_memory: fused K|V projection per cell, one lane-dense [.., 2*Md] slab
# ----------------------------------------------------------------------------
def _create_mem_kernel(c_ref, mask_ref, wkv_ref, bkv_ref, kv_ref):
    x = c_ref[...]                                 # [B, ts, H]
    msk = mask_ref[...]                            # [B, ts, 1]
    kv = (_mm(x, wkv_ref[0]) + bkv_ref[0]) * msk   # [B, ts, 2*Md]
    # single lane-dense store; K/V split happens in the wrapper slice
    kv_ref[...] = kv[None].astype(kv_ref.dtype)


def create_memory(compressed, mask, wkv, bkv, memory_dim, kv_dtype):
    B, S, H = compressed.shape
    C = wkv.shape[0]
    Md = memory_dim
    bud = _budgets()
    ts = _row_tile(B, S, H, bud['row'])
    ns = _cdiv(S, ts)
    mask3 = mask.reshape(B, S, 1)
    kv = pl.pallas_call(
        _create_mem_kernel,
        out_shape=jax.ShapeDtypeStruct((C, B, S, 2 * Md), kv_dtype),
        grid=(C, ns),
        in_specs=[
            pl.BlockSpec((B, ts, H), lambda c, i: (0, i, 0)),
            pl.BlockSpec((B, ts, 1), lambda c, i: (0, i, 0)),
            pl.BlockSpec((1, H, 2 * Md), lambda c, i: (c, 0, 0)),
            pl.BlockSpec((1, 1, 2 * Md), lambda c, i: (c, 0, 0)),
        ],
        out_specs=pl.BlockSpec((1, B, ts, 2 * Md), lambda c, i: (c, 0, i, 0)),
        compiler_params=pltpu.CompilerParams(
            dimension_semantics=("parallel", "parallel"),
            vmem_limit_bytes=bud['vmem_limit']),
    )(compressed, mask3, wkv, bkv)
    return kv[..., :Md], kv[..., Md:]


# ----------------------------------------------------------------------------
# parameters (deterministic synthetic init; shapes follow the nn.Module)
# ----------------------------------------------------------------------------
def init_params(key, hidden_size, num_cells=NUM_CELLS, weight_dtype=jnp.bfloat16):
    md = hidden_size // 2
    ks = jax.random.split(key, 15)

    def w(k, shape, scale=0.02, dtype=weight_dtype):
        return (scale * jax.random.normal(k, shape)).astype(dtype)

    wk = w(ks[0], (num_cells, hidden_size, md))                 # key_proj W^T
    bk = w(ks[1], (num_cells, 1, md), dtype=jnp.float32)        # key_proj bias
    wv = w(ks[2], (num_cells, hidden_size, md))                 # value_proj W^T
    bv = w(ks[3], (num_cells, 1, md), dtype=jnp.float32)        # value_proj bias

    return dict(
        wk=wk, bk=bk,
        # fused K|V projection for create_memory (one matmul per cell)
        wkv=jnp.concatenate([wk, wv], axis=-1),                 # (C, H, 2*Md)
        bkv=jnp.concatenate([bk, bv], axis=-1),                 # (C, 1, 2*Md)
        wo=w(ks[4], (num_cells, md, hidden_size)),              # output_proj W^T
        bo=w(ks[5], (num_cells, 1, hidden_size), dtype=jnp.float32),
        # cell_router
        wr=w(ks[6], (hidden_size, num_cells)),
        br=w(ks[7], (1, 1, num_cells), dtype=jnp.float32),
        # compressor MLP
        w1=w(ks[8], (hidden_size, 2 * hidden_size)),
        b1=w(ks[9], (1, 1, 2 * hidden_size), dtype=jnp.float32),
        w2=w(ks[10], (2 * hidden_size, hidden_size)),
        b2=w(ks[11], (1, 1, hidden_size), dtype=jnp.float32),
        # memory_gate Linear(2H,1) split into the h-half and the mem-half
        wg_h=w(ks[12], (1, 1, hidden_size), dtype=jnp.float32),
        wg_m=w(ks[13], (1, 1, hidden_size), dtype=jnp.float32),
        bg=w(ks[14], (1, 1, 1), dtype=jnp.float32),
    )


# ----------------------------------------------------------------------------
# forward (ContextMemoryModule.forward)
# ----------------------------------------------------------------------------
def context_memory_forward(params, hidden_states, attention_mask=None,
                           memory=None, kv_dtype=jnp.bfloat16):
    B, S, H = hidden_states.shape
    Md = H // 2
    C = NUM_CELLS

    if memory is None:
        mem_keys = jnp.zeros((C, B, 0, Md), kv_dtype)
        mem_vals = jnp.zeros((C, B, 0, Md), kv_dtype)
    else:
        mem_keys, mem_vals = memory
    M = mem_keys.shape[2]

    # 1+2+5) fused router softmax + per-cell attention + gated residual.
    #    Empty memory: 8 zero K/V rows -> uniform softmax @ zero values == 0
    #    context -> cell_out == output_proj bias, identical to the reference's
    #    zero-length matmul path.
    if M == 0:
        attn_keys = jnp.zeros((C, B, 8, Md), kv_dtype)
        attn_vals = jnp.zeros((C, B, 8, Md), kv_dtype)
        attn_len = 8
    else:
        attn_keys, attn_vals, attn_len = mem_keys, mem_vals, M

    updated = attend_router_gate(hidden_states, params,
                                 attn_keys, attn_vals, attn_len, Md)

    # 3) compress_memory — subsample BEFORE the per-token MLP (identical math,
    #    stride x fewer FLOPs / bytes).
    if attention_mask is None:
        mask = jnp.ones((B, S), jnp.float32)
    else:
        mask = attention_mask.astype(jnp.float32)
    if S > 512:
        stride = S // 512
        hs_c = hidden_states[:, ::stride, :]
        mask = mask[:, ::stride]
    else:
        hs_c = hidden_states
    compressed = compress(hs_c, params['w1'], params['b1'],
                          params['w2'], params['b2'])

    # 4) create new memory per cell, concat with old, truncate (plain-JAX glue)
    # TODO(synk): replace concat+truncate with a fixed [C,B,2048,Md] ring
    # buffer updated in place via input_output_aliases + a scalar-prefetched
    # write offset (avoids copying the whole cache through HBM every step).
    new_keys, new_vals = create_memory(compressed, mask,
                                       params['wkv'], params['bkv'],
                                       Md, kv_dtype)
    combined_keys = jnp.concatenate([mem_keys, new_keys], axis=2)
    combined_vals = jnp.concatenate([mem_vals, new_vals], axis=2)
    if combined_keys.shape[2] > MAX_MEMORY_LEN:
        combined_keys = combined_keys[:, :, -MAX_MEMORY_LEN:, :]
        combined_vals = combined_vals[:, :, -MAX_MEMORY_LEN:, :]

    return updated, (combined_keys, combined_vals)


# ----------------------------------------------------------------------------
if __name__ == "__main__":
    key = jax.random.PRNGKey(0)
    B, S, H = 2, 8, 32          # hidden_size=32 -> memory_dim=16, 16 cells

    k_x, k_p = jax.random.split(key)
    hidden_states = jax.random.normal(k_x, (B, S, H), dtype=jnp.float32)
    params = init_params(k_p, H)

    # first call: memory=None (empty memory -> zero-context path)
    out1, mem1 = context_memory_forward(params, hidden_states,
                                        attention_mask=None, memory=None)
    # second call: non-empty memory -> exercises real attention over M=8 rows
    out2, mem2 = context_memory_forward(params, out1,
                                        attention_mask=None, memory=mem1)

    jax.block_until_ready(out2)
    jax.block_until_ready(mem2[0])
    assert out2.shape == (B, S, H)
    assert mem2[0].shape == (NUM_CELLS, B, 16, H // 2)
    assert bool(jnp.all(jnp.isfinite(out2)))
    print("KERNEL_OK")
</pallas_src>

<mosaic_0001>
module attributes {stable_mosaic.version = 11 : i64} {
  func.func @_attend_gate_kernel(%arg0: i32, %arg1: i32, %arg2: i32, %arg3: memref<2x8x32xf32, #tpu.memory_space<vmem>>, %arg4: memref<32x16xbf16, #tpu.memory_space<vmem>>, %arg5: memref<1x1x16xf32, #tpu.memory_space<vmem>>, %arg6: memref<1x32x16xbf16, #tpu.memory_space<vmem>>, %arg7: memref<1x1x16xf32, #tpu.memory_space<vmem>>, %arg8: memref<1x2x8x16xbf16, #tpu.memory_space<vmem>>, %arg9: memref<1x2x8x16xbf16, #tpu.memory_space<vmem>>, %arg10: memref<1x16x32xbf16, #tpu.memory_space<vmem>>, %arg11: memref<1x1x32xf32, #tpu.memory_space<vmem>>, %arg12: memref<1x1x32xf32, #tpu.memory_space<vmem>>, %arg13: memref<1x1x32xf32, #tpu.memory_space<vmem>>, %arg14: memref<1x1x1xf32, #tpu.memory_space<vmem>>, %arg15: memref<2x8x32xf32, #tpu.memory_space<vmem>>, %arg16: memref<2x8x16xf32, #tpu.memory_space<vmem>>, %arg17: memref<2x8x32xf32, #tpu.memory_space<vmem>>) attributes {dimension_semantics = [#tpu.dimension_semantics<parallel>, #tpu.dimension_semantics<arbitrary>, #tpu.dimension_semantics<arbitrary>], iteration_bounds = array<i64: 1, 16, 1>, scalar_prefetch = 0 : i64, scratch_operands = 2 : i64, tpu.core_type = #tpu.core_type<tc>, window_params = [{transform_indices = @transform_0, window_bounds = array<i64: 2, 8, 32>}, {pipeline_mode = #tpu.pipeline_mode<synchronous>, transform_indices = @transform_1, window_bounds = array<i64: 32, 16>}, {pipeline_mode = #tpu.pipeline_mode<synchronous>, transform_indices = @transform_2, window_bounds = array<i64: 1, 1, 16>}, {transform_indices = @transform_3, window_bounds = array<i64: 1, 32, 16>}, {transform_indices = @transform_4, window_bounds = array<i64: 1, 1, 16>}, {transform_indices = @transform_5, window_bounds = array<i64: 1, 2, 8, 16>}, {transform_indices = @transform_6, window_bounds = array<i64: 1, 2, 8, 16>}, {transform_indices = @transform_7, window_bounds = array<i64: 1, 16, 32>}, {transform_indices = @transform_8, window_bounds = array<i64: 1, 1, 32>}, {pipeline_mode = #tpu.pipeline_mode<synchronous>, transform_indices = @transform_9, window_bounds = array<i64: 1, 1, 32>}, {pipeline_mode = #tpu.pipeline_mode<synchronous>, transform_indices = @transform_10, window_bounds = array<i64: 1, 1, 32>}, {pipeline_mode = #tpu.pipeline_mode<synchronous>, transform_indices = @transform_11, window_bounds = array<i64: 1, 1, 1>}, {transform_indices = @transform_12, window_bounds = array<i64: 2, 8, 32>}]} {
    %c0_i32 = arith.constant 0 : i32
    %0 = arith.cmpi eq, %arg1, %c0_i32 : i32
    %c0_i32_0 = arith.constant 0 : i32
    %1 = arith.cmpi eq, %arg2, %c0_i32_0 : i32
    %2 = arith.andi %0, %1 : i1
    %3 = arith.extui %2 : i1 to i32
    %c0_i32_1 = arith.constant 0 : i32
    %4 = arith.cmpi ne, %3, %c0_i32_1 : i32
    scf.if %4 {
      %c0_42 = arith.constant 0 : index
      %c0_43 = arith.constant 0 : index
      %c0_44 = arith.constant 0 : index
      %68 = vector.load %arg3[%c0_42, %c0_43, %c0_44] : memref<2x8x32xf32, #tpu.memory_space<vmem>>, vector<2x8x32xf32>
      %c0_45 = arith.constant 0 : index
      %c0_46 = arith.constant 0 : index
      %69 = vector.load %arg4[%c0_45, %c0_46] : memref<32x16xbf16, #tpu.memory_space<vmem>>, vector<32x16xbf16>
      %70 = vector.shape_cast %68 : vector<2x8x32xf32> to vector<16x32xf32>
      %71 = arith.truncf %70 : vector<16x32xf32> to vector<16x32xbf16>
      %cst_47 = arith.constant dense<0.000000e+00> : vector<16x16xf32>
      %72 = tpu.matmul %71, %69, %cst_47 {dimension_numbers = #tpu.dot_dimension_numbers<[1], [0], [0], [1], [0, 0, 1, 1], [], []>} : vector<16x32xbf16>, vector<32x16xbf16>, vector<16x16xf32> -> vector<16x16xf32>
      %73 = vector.shape_cast %72 : vector<16x16xf32> to vector<2x8x16xf32>
      %c0_48 = arith.constant 0 : index
      %c0_49 = arith.constant 0 : index
      %c0_50 = arith.constant 0 : index
      %74 = vector.load %arg5[%c0_48, %c0_49, %c0_50] : memref<1x1x16xf32, #tpu.memory_space<vmem>>, vector<1x1x16xf32>
      %75 = vector.broadcast %74 : vector<1x1x16xf32> to vector<2x8x16xf32>
      %76 = arith.addf %73, %75 : vector<2x8x16xf32>
      %cst_51 = arith.constant dense<0xFF800000> : vector<2x8xf32>
      %77 = vector.multi_reduction <maximumf>, %76, %cst_51 [2] : vector<2x8x16xf32> to vector<2x8xf32>
      %78 = vector.shape_cast %77 : vector<2x8xf32> to vector<2x8x1xf32>
      %79 = vector.broadcast %78 : vector<2x8x1xf32> to vector<2x8x16xf32>
      %80 = arith.subf %76, %79 : vector<2x8x16xf32>
      %81 = math.exp %80 : vector<2x8x16xf32>
      %cst_52 = arith.constant dense<0.000000e+00> : vector<2x8xf32>
      %82 = vector.multi_reduction <add>, %81, %cst_52 [2] : vector<2x8x16xf32> to vector<2x8xf32>
      %83 = vector.shape_cast %82 : vector<2x8xf32> to vector<2x8x1xf32>
      %84 = tpu.reciprocal %83 {approx = true} : vector<2x8x1xf32> -> vector<2x8x1xf32>
      %85 = vector.broadcast %84 : vector<2x8x1xf32> to vector<2x8x16xf32>
      %86 = arith.mulf %81, %85 : vector<2x8x16xf32>
      %c0_53 = arith.constant 0 : index
      %c0_54 = arith.constant 0 : index
      %c0_55 = arith.constant 0 : index
      %87 = vector.load %arg16[%c0_53, %c0_54, %c0_55] : memref<2x8x16xf32, #tpu.memory_space<vmem>>, vector<2x8x16xf32>
      tpu.vector_store %arg16[%c0_53, %c0_54, %c0_55], %86 {strides = array<i32>} : memref<2x8x16xf32, #tpu.memory_space<vmem>>, vector<2x8x16xf32>,
      %cst_56 = arith.constant 0.000000e+00 : f32
      %88 = vector.broadcast %cst_56 : f32 to vector<2x8x32xf32>
      %c0_57 = arith.constant 0 : index
      %c0_58 = arith.constant 0 : index
      %c0_59 = arith.constant 0 : index
      %89 = vector.load %arg17[%c0_57, %c0_58, %c0_59] : memref<2x8x32xf32, #tpu.memory_space<vmem>>, vector<2x8x32xf32>
      tpu.vector_store %arg17[%c0_57, %c0_58, %c0_59], %88 {strides = array<i32>} : memref<2x8x32xf32, #tpu.memory_space<vmem>>, vector<2x8x32xf32>,
    } else {
    }
    %c0 = arith.constant 0 : index
    %c0_2 = arith.constant 0 : index
    %c0_3 = arith.constant 0 : index
    %5 = vector.load %arg3[%c0, %c0_2, %c0_3] : memref<2x8x32xf32, #tpu.memory_space<vmem>>, vector<2x8x32xf32>
    %c0_4 = arith.constant 0 : index
    %c0_5 = arith.constant 0 : index
    %c0_6 = arith.constant 0 : index
    %6 = vector.load %arg6[%c0_4, %c0_5, %c0_6] : memref<1x32x16xbf16, #tpu.memory_space<vmem>>, vector<1x32x16xbf16>
    %7 = vector.shape_cast %6 : vector<1x32x16xbf16> to vector<32x16xbf16>
    %8 = vector.shape_cast %5 : vector<2x8x32xf32> to vector<16x32xf32>
    %9 = arith.truncf %8 : vector<16x32xf32> to vector<16x32xbf16>
    %cst = arith.constant dense<0.000000e+00> : vector<16x16xf32>
    %10 = tpu.matmul %9, %7, %cst {dimension_numbers = #tpu.dot_dimension_numbers<[1], [0], [0], [1], [0, 0, 1, 1], [], []>} : vector<16x32xbf16>, vector<32x16xbf16>, vector<16x16xf32> -> vector<16x16xf32>
    %11 = vector.shape_cast %10 : vector<16x16xf32> to vector<2x8x16xf32>
    %c0_7 = arith.constant 0 : index
    %c0_8 = arith.constant 0 : index
    %c0_9 = arith.constant 0 : index
    %12 = vector.load %arg7[%c0_7, %c0_8, %c0_9] : memref<1x1x16xf32, #tpu.memory_space<vmem>>, vector<1x1x16xf32>
    %13 = vector.shape_cast %12 : vector<1x1x16xf32> to vector<1x16xf32>
    %14 = vector.shape_cast %13 : vector<1x16xf32> to vector<1x1x16xf32>
    %15 = vector.broadcast %14 : vector<1x1x16xf32> to vector<2x8x16xf32>
    %16 = arith.addf %11, %15 : vector<2x8x16xf32>
    %cst_10 = arith.constant 2.500000e-01 : f32
    %17 = vector.broadcast %cst_10 : f32 to vector<2x8x16xf32>
    %18 = arith.mulf %16, %17 : vector<2x8x16xf32>
    %19 = arith.truncf %18 : vector<2x8x16xf32> to vector<2x8x16xbf16>
    %c0_11 = arith.constant 0 : index
    %c0_12 = arith.constant 0 : index
    %c0_13 = arith.constant 0 : index
    %c0_14 = arith.constant 0 : index
    %20 = vector.load %arg8[%c0_11, %c0_12, %c0_13, %c0_14] : memref<1x2x8x16xbf16, #tpu.memory_space<vmem>>, vector<1x2x8x16xbf16>
    %21 = vector.shape_cast %20 : vector<1x2x8x16xbf16> to vector<2x8x16xbf16>
    %c0_15 = arith.constant 0 : index
    %c0_16 = arith.constant 0 : index
    %c0_17 = arith.constant 0 : index
    %c0_18 = arith.constant 0 : index
    %22 = vector.load %arg9[%c0_15, %c0_16, %c0_17, %c0_18] : memref<1x2x8x16xbf16, #tpu.memory_space<vmem>>, vector<1x2x8x16xbf16>
    %23 = vector.shape_cast %22 : vector<1x2x8x16xbf16> to vector<2x8x16xbf16>
    "tpu.trace_start"() <{level = 10 : i32, message = "bqd,bkd->bqk"}> : () -> ()
    %cst_19 = arith.constant dense<0.000000e+00> : vector<2x8x8xf32>
    %24 = tpu.matmul %19, %21, %cst_19 {dimension_numbers = #tpu.dot_dimension_numbers<[2], [2], [1], [1], [0, 0, 0, 1, 1, 1], [0], [0]>} : vector<2x8x16xbf16>, vector<2x8x16xbf16>, vector<2x8x8xf32> -> vector<2x8x8xf32>
    "tpu.trace_stop"() : () -> ()
    %cst_20 = arith.constant dense<0xFF800000> : vector<2x8xf32>
    %25 = vector.multi_reduction <maximumf>, %24, %cst_20 [2] : vector<2x8x8xf32> to vector<2x8xf32>
    %26 = vector.shape_cast %25 : vector<2x8xf32> to vector<2x8x1xf32>
    %27 = vector.broadcast %26 : vector<2x8x1xf32> to vector<2x8x8xf32>
    %28 = arith.subf %24, %27 : vector<2x8x8xf32>
    %29 = math.exp %28 : vector<2x8x8xf32>
    %cst_21 = arith.constant dense<0.000000e+00> : vector<2x8xf32>
    %30 = vector.multi_reduction <add>, %29, %cst_21 [2] : vector<2x8x8xf32> to vector<2x8xf32>
    %31 = vector.shape_cast %30 : vector<2x8xf32> to vector<2x8x1xf32>
    %32 = tpu.reciprocal %31 {approx = true} : vector<2x8x1xf32> -> vector<2x8x1xf32>
    %33 = vector.broadcast %32 : vector<2x8x1xf32> to vector<2x8x8xf32>
    %34 = arith.mulf %29, %33 : vector<2x8x8xf32>
    %35 = arith.truncf %34 : vector<2x8x8xf32> to vector<2x8x8xbf16>
    "tpu.trace_start"() <{level = 10 : i32, message = "bqk,bkd->bqd"}> : () -> ()
    %cst_22 = arith.constant dense<0.000000e+00> : vector<2x8x16xf32>
    %36 = tpu.matmul %35, %23, %cst_22 {dimension_numbers = #tpu.dot_dimension_numbers<[2], [1], [1], [2], [0, 0, 0, 1, 1, 2], [0], [0]>} : vector<2x8x8xbf16>, vector<2x8x16xbf16>, vector<2x8x16xf32> -> vector<2x8x16xf32>
    "tpu.trace_stop"() : () -> ()
    %c0_23 = arith.constant 0 : index
    %c0_24 = arith.constant 0 : index
    %c0_25 = arith.constant 0 : index
    %37 = vector.load %arg10[%c0_23, %c0_24, %c0_25] : memref<1x16x32xbf16, #tpu.memory_space<vmem>>, vector<1x16x32xbf16>
    %38 = vector.shape_cast %37 : vector<1x16x32xbf16> to vector<16x32xbf16>
    %39 = vector.shape_cast %36 : vector<2x8x16xf32> to vector<16x16xf32>
    %40 = arith.truncf %39 : vector<16x16xf32> to vector<16x16xbf16>
    %cst_26 = arith.constant dense<0.000000e+00> : vector<16x32xf32>
    %41 = tpu.matmul %40, %38, %cst_26 {dimension_numbers = #tpu.dot_dimension_numbers<[1], [0], [0], [1], [0, 0, 1, 1], [], []>} : vector<16x16xbf16>, vector<16x32xbf16>, vector<16x32xf32> -> vector<16x32xf32>
    %42 = vector.shape_cast %41 : vector<16x32xf32> to vector<2x8x32xf32>
    %c0_27 = arith.constant 0 : index
    %c0_28 = arith.constant 0 : index
    %c0_29 = arith.constant 0 : index
    %43 = vector.load %arg11[%c0_27, %c0_28, %c0_29] : memref<1x1x32xf32, #tpu.memory_space<vmem>>, vector<1x1x32xf32>
    %44 = vector.shape_cast %43 : vector<1x1x32xf32> to vector<1x32xf32>
    %45 = vector.shape_cast %44 : vector<1x32xf32> to vector<1x1x32xf32>
    %46 = vector.broadcast %45 : vector<1x1x32xf32> to vector<2x8x32xf32>
    %47 = arith.addf %42, %46 : vector<2x8x32xf32>
    %48 = tpu.iota {dimensions = array<i32: 2>} : vector<1x1x16xi32>
    %c0_30 = arith.constant 0 : index
    %c0_31 = arith.constant 0 : index
    %c0_32 = arith.constant 0 : index
    %49 = vector.load %arg16[%c0_30, %c0_31, %c0_32] : memref<2x8x16xf32, #tpu.memory_space<vmem>>, vector<2x8x16xf32>
    %50 = vector.broadcast %arg1 : i32 to vector<1x1x16xi32>
    %51 = arith.cmpi eq, %48, %50 : vector<1x1x16xi32>
    %52 = arith.extui %51 : vector<1x1x16xi1> to vector<1x1x16xi32>
    %53 = arith.sitofp %52 : vector<1x1x16xi32> to vector<1x1x16xf32>
    %54 = vector.broadcast %53 : vector<1x1x16xf32> to vector<2x8x16xf32>
    %55 = arith.mulf %49, %54 : vector<2x8x16xf32>
    %cst_33 = arith.constant dense<0.000000e+00> : vector<2x8xf32>
    %56 = vector.multi_reduction <add>, %55, %cst_33 [2] : vector<2x8x16xf32> to vector<2x8xf32>
    %57 = vector.shape_cast %56 : vector<2x8xf32> to vector<2x8x1xf32>
    %c0_34 = arith.constant 0 : index
    %c0_35 = arith.constant 0 : index
    %c0_36 = arith.constant 0 : index
    %58 = vector.load %arg17[%c0_34, %c0_35, %c0_36] : memref<2x8x32xf32, #tpu.memory_space<vmem>>, vector<2x8x32xf32>
    %59 = vector.broadcast %57 : vector<2x8x1xf32> to vector<2x8x32xf32>
    %60 = arith.mulf %59, %47 : vector<2x8x32xf32>
    %61 = arith.addf %58, %60 : vector<2x8x32xf32>
    %c0_37 = arith.constant 0 : index
    %c0_38 = arith.constant 0 : index
    %c0_39 = arith.constant 0 : index
    %62 = vector.load %arg17[%c0_37, %c0_38, %c0_39] : memref<2x8x32xf32, #tpu.memory_space<vmem>>, vector<2x8x32xf32>
    tpu.vector_store %arg17[%c0_37, %c0_38, %c0_39], %61 {strides = array<i32>} : memref<2x8x32xf32, #tpu.memory_space<vmem>>, vector<2x8x32xf32>,
    %c15_i32 = arith.constant 15 : i32
    %63 = arith.cmpi eq, %arg1, %c15_i32 : i32
    %c0_i32_40 = arith.constant 0 : i32
    %64 = arith.cmpi eq, %arg2, %c0_i32_40 : i32
    %65 = arith.andi %63, %64 : i1
    %66 = arith.extui %65 : i1 to i32
    %c0_i32_41 = arith.constant 0 : i32
    %67 = arith.cmpi ne, %66, %c0_i32_41 : i32
    scf.if %67 {
      %c0_42 = arith.constant 0 : index
      %c0_43 = arith.constant 0 : index
      %c0_44 = arith.constant 0 : index
      %68 = vector.load %arg3[%c0_42, %c0_43, %c0_44] : memref<2x8x32xf32, #tpu.memory_space<vmem>>, vector<2x8x32xf32>
      %c0_45 = arith.constant 0 : index
      %c0_46 = arith.constant 0 : index
      %c0_47 = arith.constant 0 : index
      %69 = vector.load %arg17[%c0_45, %c0_46, %c0_47] : memref<2x8x32xf32, #tpu.memory_space<vmem>>, vector<2x8x32xf32>
      %c0_48 = arith.constant 0 : index
      %c0_49 = arith.constant 0 : index
      %c0_50 = arith.constant 0 : index
      %70 = vector.load %arg12[%c0_48, %c0_49, %c0_50] : memref<1x1x32xf32, #tpu.memory_space<vmem>>, vector<1x1x32xf32>
      %71 = vector.broadcast %70 : vector<1x1x32xf32> to vector<2x8x32xf32>
      %72 = arith.mulf %68, %71 : vector<2x8x32xf32>
      %cst_51 = arith.constant dense<0.000000e+00> : vector<2x8xf32>
      %73 = vector.multi_reduction <add>, %72, %cst_51 [2] : vector<2x8x32xf32> to vector<2x8xf32>
      %74 = vector.shape_cast %73 : vector<2x8xf32> to vector<2x8x1xf32>
      %c0_52 = arith.constant 0 : index
      %c0_53 = arith.constant 0 : index
      %c0_54 = arith.constant 0 : index
      %75 = vector.load %arg13[%c0_52, %c0_53, %c0_54] : memref<1x1x32xf32, #tpu.memory_space<vmem>>, vector<1x1x32xf32>
      %76 = vector.broadcast %75 : vector<1x1x32xf32> to vector<2x8x32xf32>
      %77 = arith.mulf %69, %76 : vector<2x8x32xf32>
      %cst_55 = arith.constant dense<0.000000e+00> : vector<2x8xf32>
      %78 = vector.multi_reduction <add>, %77, %cst_55 [2] : vector<2x8x32xf32> to vector<2x8xf32>
      %79 = vector.shape_cast %78 : vector<2x8xf32> to vector<2x8x1xf32>
      %80 = arith.addf %74, %79 : vector<2x8x1xf32>
      %c0_56 = arith.constant 0 : index
      %c0_57 = arith.constant 0 : index
      %c0_58 = arith.constant 0 : index
      %81 = vector.load %arg14[%c0_56, %c0_57, %c0_58] : memref<1x1x1xf32, #tpu.memory_space<vmem>>, vector<1x1x1xf32>
      %82 = vector.broadcast %81 : vector<1x1x1xf32> to vector<2x8x1xf32>
      %83 = arith.addf %80, %82 : vector<2x8x1xf32>
      %84 = arith.negf %83 : vector<2x8x1xf32>
      %85 = math.exp %84 : vector<2x8x1xf32>
      %cst_59 = arith.constant 1.000000e+00 : f32
      %86 = vector.broadcast %cst_59 : f32 to vector<2x8x1xf32>
      %87 = arith.addf %86, %85 : vector<2x8x1xf32>
      %88 = arith.divf %86, %87 : vector<2x8x1xf32>
      %89 = vector.broadcast %88 : vector<2x8x1xf32> to vector<2x8x32xf32>
      %90 = arith.mulf %89, %69 : vector<2x8x32xf32>
      %91 = arith.addf %68, %90 : vector<2x8x32xf32>
      %c0_60 = arith.constant 0 : index
      %c0_61 = arith.constant 0 : index
      %c0_62 = arith.constant 0 : index
      %92 = vector.load %arg15[%c0_60, %c0_61, %c0_62] : memref<2x8x32xf32, #tpu.memory_space<vmem>>, vector<2x8x32xf32>
      tpu.vector_store %arg15[%c0_60, %c0_61, %c0_62], %91 {strides = array<i32>} : memref<2x8x32xf32, #tpu.memory_space<vmem>>, vector<2x8x32xf32>,
    } else {
    }
    return
  }
  func.func @transform_0(%arg0: i32, %arg1: i32, %arg2: i32) -> (i32, i32, i32) {
    %c0_i32 = arith.constant 0 : i32
    %c0_i32_0 = arith.constant 0 : i32
    %c0_i32_1 = arith.constant 0 : i32
    return %c0_i32, %arg0, %c0_i32_0 : i32, i32, i32
  }
  func.func @transform_1(%arg0: i32, %arg1: i32, %arg2: i32) -> (i32, i32) {
    %c0_i32 = arith.constant 0 : i32
    %c0_i32_0 = arith.constant 0 : i32
    %c0_i32_1 = arith.constant 0 : i32
    return %c0_i32, %c0_i32_0 : i32, i32
  }
  func.func @transform_2(%arg0: i32, %arg1: i32, %arg2: i32) -> (i32, i32, i32) {
    %c0_i32 = arith.constant 0 : i32
    %c0_i32_0 = arith.constant 0 : i32
    %c0_i32_1 = arith.constant 0 : i32
    %c0_i32_2 = arith.constant 0 : i32
    return %c0_i32, %c0_i32_0, %c0_i32_1 : i32, i32, i32
  }
  func.func @transform_3(%arg0: i32, %arg1: i32, %arg2: i32) -> (i32, i32, i32) {
    %c0_i32 = arith.constant 0 : i32
    %c0_i32_0 = arith.constant 0 : i32
    %c0_i32_1 = arith.constant 0 : i32
    return %arg1, %c0_i32, %c0_i32_0 : i32, i32, i32
  }
  func.func @transform_4(%arg0: i32, %arg1: i32, %arg2: i32) -> (i32, i32, i32) {
    %c0_i32 = arith.constant 0 : i32
    %c0_i32_0 = arith.constant 0 : i32
    %c0_i32_1 = arith.constant 0 : i32
    return %arg1, %c0_i32, %c0_i32_0 : i32, i32, i32
  }
  func.func @transform_5(%arg0: i32, %arg1: i32, %arg2: i32) -> (i32, i32, i32, i32) {
    %c0_i32 = arith.constant 0 : i32
    %c0_i32_0 = arith.constant 0 : i32
    %c0_i32_1 = arith.constant 0 : i32
    return %arg1, %c0_i32, %arg2, %c0_i32_0 : i32, i32, i32, i32
  }
  func.func @transform_6(%arg0: i32, %arg1: i32, %arg2: i32) -> (i32, i32, i32, i32) {
    %c0_i32 = arith.constant 0 : i32
    %c0_i32_0 = arith.constant 0 : i32
    %c0_i32_1 = arith.constant 0 : i32
    return %arg1, %c0_i32, %arg2, %c0_i32_0 : i32, i32, i32, i32
  }
  func.func @transform_7(%arg0: i32, %arg1: i32, %arg2: i32) -> (i32, i32, i32) {
    %c0_i32 = arith.constant 0 : i32
    %c0_i32_0 = arith.constant 0 : i32
    %c0_i32_1 = arith.constant 0 : i32
    return %arg1, %c0_i32, %c0_i32_0 : i32, i32, i32
  }
  func.func @transform_8(%arg0: i32, %arg1: i32, %arg2: i32) -> (i32, i32, i32) {
    %c0_i32 = arith.constant 0 : i32
    %c0_i32_0 = arith.constant 0 : i32
    %c0_i32_1 = arith.constant 0 : i32
    return %arg1, %c0_i32, %c0_i32_0 : i32, i32, i32
  }
  func.func @transform_9(%arg0: i32, %arg1: i32, %arg2: i32) -> (i32, i32, i32) {
    %c0_i32 = arith.constant 0 : i32
    %c0_i32_0 = arith.constant 0 : i32
    %c0_i32_1 = arith.constant 0 : i32
    %c0_i32_2 = arith.constant 0 : i32
    return %c0_i32, %c0_i32_0, %c0_i32_1 : i32, i32, i32
  }
  func.func @transform_10(%arg0: i32, %arg1: i32, %arg2: i32) -> (i32, i32, i32) {
    %c0_i32 = arith.constant 0 : i32
    %c0_i32_0 = arith.constant 0 : i32
    %c0_i32_1 = arith.constant 0 : i32
    %c0_i32_2 = arith.constant 0 : i32
    return %c0_i32, %c0_i32_0, %c0_i32_1 : i32, i32, i32
  }
  func.func @transform_11(%arg0: i32, %arg1: i32, %arg2: i32) -> (i32, i32, i32) {
    %c0_i32 = arith.constant 0 : i32
    %c0_i32_0 = arith.constant 0 : i32
    %c0_i32_1 = arith.constant 0 : i32
    %c0_i32_2 = arith.constant 0 : i32
    return %c0_i32, %c0_i32_0, %c0_i32_1 : i32, i32, i32
  }
  func.func @transform_12(%arg0: i32, %arg1: i32, %arg2: i32) -> (i32, i32, i32) {
    %c0_i32 = arith.constant 0 : i32
    %c0_i32_0 = arith.constant 0 : i32
    %c0_i32_1 = arith.constant 0 : i32
    return %c0_i32, %arg0, %c0_i32_0 : i32, i32, i32
  }
}

</mosaic_0001>

<bundles_post_ra>
// kernel: tpu_custom_call.1
= control target key start
LH: loop header
LB: loop body
LE: loop exit
PB: predicated region body
PF: predicated region fallthrough
CT: control target
= control target key end

     0   :  { %s1770_s0 = inlined_call_operand.vmem [shape: f32[2,8,32], index: 0, kind: input, shape index: {}]   ;;  %s1771_s1 = inlined_call_operand.vmem [shape: bf16[32,16], index: 1, kind: input, shape index: {}]   ;;  %s1772_s2 = inlined_call_operand.vmem [shape: f32[1,1,16], index: 2, kind: input, shape index: {}]   ;;  %s1773_s3 = inlined_call_operand.vmem [shape: bf16[16,32,16], index: 3, kind: input, shape index: {}]   ;;  %s1774_s4 = inlined_call_operand.vmem [shape: f32[16,1,16], index: 4, kind: input, shape index: {}]   ;;  %s1775_s5 = inlined_call_operand.vmem [shape: bf16[16,2,8,16], index: 5, kind: input, shape index: {}]   ;;  %s1776_s6 = inlined_call_operand.vmem [shape: bf16[16,2,8,16], index: 6, kind: input, shape index: {}]   ;;  %s1777_s7 = inlined_call_operand.vmem [shape: bf16[16,16,32], index: 7, kind: input, shape index: {}]   ;;  %s1778_s8 = inlined_call_operand.vmem [shape: f32[16,1,32], index: 8, kind: input, shape index: {}]   ;;  %s1779_s9 = inlined_call_operand.vmem [shape: f32[1,1,32], index: 9, kind: input, shape index: {}]   ;;  %s1780_s10 = inlined_call_operand.vmem [shape: f32[1,1,32], index: 10, kind: input, shape index: {}]   ;;  %s1781_s11 = inlined_call_operand.<no memory space> [shape: f32[1,1,1], index: 11, kind: input, shape index: {}]   ;;  %s1782_s12 = inlined_call_operand.hbm [shape: f32[2,8,32], index: 12, kind: output, shape index: {}]  }
   0x1   :  { %1783 = sst [smem:[#allocation8_spill]] %s1773_s3  ;;  %v17_v0 = vstv %s1781_s11 }
   0x2   :  { %18 = vst [vmem:[#allocation4] sm:$0x1] %v17_v0 }
   0x3   :  { %19 = vsyncpa [#allocation6], 0  ;;  %s1568_s23 = smov 0   ;;  %s1570_s24 = smov 0  }
   0x4   :  { %s1572_s25 = smov 0  }
   0x5 LB: > { %s40_s26 = sadd.s32 1, %s1486_s24  ;;  %p1265_p1 = scmp.ge.s32.totalorder %s1490_s25, 1  ;;  %s1490_s25 = sphi %s1572_s25, %s25_s25   ;;  %s1486_s24 = sphi %s1570_s24, %s1789_s24   ;;  %s1482_s23 = sphi %s1568_s23, %s1788_s23  }
   0x6   : > { %p42_p0 = scmp.ge.s32.totalorder %s40_s26, 16  ;;  %p449_p2 = scmp.lt.s32.totalorder %s1490_s25, 17 }
   0x8   : > { %s1791_s26 = smov (%p42_p0, %s40_s26), 0  ;;  %p450_p3 = pnand %p1265_p1, %p449_p2 }
   0x9   : > { %p521_p4 = scmp.lt.s32.totalorder (!%p450_p3), %s1482_s23, 15  ;;  %p554_p5 = scmp.eq.s32.totalorder (!%p450_p3), %s1482_s23, 0 }
   0xa   : > { %453 = sbr.rel (%p450_p3) target bundleno = 2097 (0x831), region = 68  ;;  %s1784_s3 = sld [smem:[#allocation8_spill]] (!%p450_p3) }
  0x11   : > { %s1592_s27 = scalar_select %p521_p4, %s1482_s23, 15 }
  0x12   : > { %559 = sbr.rel (!%p554_p5) target bundleno = 560 (0x230), region = 72  ;;  %v1407_v1 = vld [vmem:[%s1771_s1] sm:$0xff] (%p554_p5)   ;;  %v1492_v2 = vmov (%p554_p5), 0.0   ;;  %v1408_v3 = vld [vmem:[%s1771_s1 + $0x8] sm:$0xff] (%p554_p5)   ;;  %vm1493_vm0 = vmmov (%p554_p5), 0   ;;  %vm579_vm1 = vcmask (%p554_p5), 261120  }
  0x13   : > { %s1301_s28 = sshll.u32 %s1592_s27, 4  ;;  %s1605_s17 = sshll.u32 %s1592_s27, 3  ;;  %1323 = vmatprep.subr.bf16.mxu0 (%p554_p5), %v1492_v2  ;;  %1327 = vmatprep.mubr.msk.bf16.mxu0 (%p554_p5), %vm1493_vm0, %v1492_v2  ;;  %v560_v4 = vld [vmem:[%s1770_s0] sm:$0xff] (%p554_p5)  ;;  %v561_v5 = vld [vmem:[%s1770_s0 + $0x8] sm:$0xff] (%p554_p5)  ;;  %658 = vst.msk [vmem:[#allocation3] sm:$0xff] (%p554_p5), %vm579_vm1, %v1492_v2  ;;  %659 = vst.msk [vmem:[#allocation3 + $0x8] sm:$0xff] (%p554_p5), %vm579_vm1, %v1492_v2 }
  0x14   : > { %s1602_s16 = scalar_lea.vmem %s1784_s3, %s1301_s28  ;;  %s1611_s20 = scalar_lea.vmem %s1775_s5, %s1605_s17  ;;  %1324 = vmatpush3.bf16.msra.mxu0 (%p554_p5), %v1407_v1  ;;  %v566_v6 = vpack.c.bf16 (%p554_p5), %v561_v5, %v560_v4  ;;  %v1278_v7 = vld [vmem:[%s1772_s2] ss:$0 sm:$0xff] (%p554_p5)  ;;  %vm633_vm2 = vcmask (%p554_p5), 130048  }
  0x15   : > { %s1617_s29 = scalar_lea.vmem %s1776_s6, %s1605_s17  ;;  %s549_s28 = scalar_lea.vmem %s1777_s7, %s1605_s17  ;;  %1325 = vmatprep.subr.bf16.mxu0 (%p554_p5), %v1492_v2 }
  0x16   : > { %s552_s13 = scalar_lea.vmem %s1778_s8, %s1592_s27 }
  0x18   : > { %1326 = vmatpush3.bf16.msra.mxu0 (%p554_p5), %v1408_v3 }
  0x1b   : > { %1328 = vmatmul.mubr.msk.bf16.vlgmr.msra.gmra.mrb[0].mxu0 %vm579_vm1, %v566_v6 }
  0xee   : > { %v617_v8 = vpop.f32.mrb[0].mxu0 }
  0xef   : > { %v631_v9 = vadd.f32 %v1278_v7, %v617_v8  ;;  %v1329_v10 = vpop.f32.mrb[1].mxu0 }
  0xf0   : > { %v620_v11 = vpop.f32.mrb[2].mxu0 }
  0xf1   : > { %v632_v12 = vadd.f32 %v1278_v7, %v620_v11  ;;  %v1330_v13 = vpop.f32.mrb[3].mxu0  ;;  %v634_v14 = vsel %vm633_vm2, %v631_v9, -inf }
  0xf2   : > { %635 = vmax.xlane.f32.xlu0 %v634_v14 }
  0xf3   : > { %v637_v15 = vsel %vm633_vm2, %v632_v12, -inf }
  0xf6   : > { %638 = vmax.xlane.f32.xlu0 %v637_v15 }
 0x17f   : > { %v636_v16 = vpop.xlane.xlu0 %635 }
 0x180   : > { %v640_v17 = vsub.f32 %v631_v9, %v636_v16 }
 0x182   : > { %v642_v18 = vmul.f32 1.442695, %v640_v17 }
 0x183   : > { %v639_v19 = vpop.xlane.xlu0 %638 }
 0x184   : > { %1409 = vpow2.f32 %v642_v18  ;;  %v641_v20 = vsub.f32 %v632_v12, %v639_v19 }
 0x186   : > { %v644_v21 = vmul.f32 1.442695, %v641_v20 }
 0x188   : > { %1411 = vpow2.f32 %v644_v21 }
 0x18e   : > { %v1410_v22 = vpop.eup %1409 }
 0x18f   : > { %v646_v23 = vsel %vm633_vm2, %v1410_v22, 0.0 }
 0x190   : > { %647 = vadd.xlane.f32.xlu1 %v646_v23 }
 0x192   : > { %v1412_v24 = vpop.eup %1411 }
 0x193   : > { %v649_v25 = vsel %vm633_vm2, %v1412_v24, 0.0 }
 0x194   : > { %650 = vadd.xlane.f32.xlu1 %v649_v25 }
 0x21d   : > { %v648_v26 = vpop.xlane.xlu1 %647 }
 0x21e   : > { %1413 = vrcp.f32 %v648_v26 }
 0x221   : > { %v651_v27 = vpop.xlane.xlu1 %650 }
 0x222   : > { %1415 = vrcp.f32 %v651_v27 }
 0x228   : > { %v1414_v28 = vpop.eup %1413 }
 0x229   : > { %v654_v29 = vmul.f32 %v1414_v28, %v1410_v22 }
 0x22b   : > { %656 = vst.msk [vmem:[#allocation2] sm:$0xff] %vm633_vm2, %v654_v29 }
 0x22c   : > { %v1416_v30 = vpop.eup %1415 }
 0x22d   : > { %v655_v31 = vmul.f32 %v1416_v30, %v1412_v24 }
 0x22f   : > { %657 = vst.msk [vmem:[#allocation2 + $0x8] sm:$0xff] %vm633_vm2, %v655_v31 }
 0x230 PF: > { %v1417_v32 = vld [vmem:[%s1602_s16] sm:$0xff]   ;;  %v1494_v33 = vmov 0.0   ;;  %v1418_v34 = vld [vmem:[%s1602_s16 + $0x8] sm:$0xff]   ;;  %vm1495_vm3 = vmmov 0   ;;  %vm679_vm4 = vcmask 261120   ;;  %vm741_vm5 = vcmask 130048   ;;  %s1785_s30 = scalar_lea.vmem %s1774_s4, %s1592_s27 }
 0x231   : > { %1331 = vmatprep.subr.bf16.mxu0 %v1494_v33  ;;  %1339 = vmatprep.subr.bf16.mxu1 %v1494_v33  ;;  %v660_v35 = vld [vmem:[%s1770_s0] sm:$0xff]  ;;  %v661_v36 = vld [vmem:[%s1770_s0 + $0x8] sm:$0xff]  ;;  %vm834_vm6 = vcmask 64512   ;;  %vm862_vm7 = vcmask 1043456   ;;  %v1014_v22 = vlaneseq  ;;  %v1018_v23 = vstv %s1482_s23  ;;  %p1038_p6 = scmp.eq.s32.totalorder %s1482_s23, 15 }
 0x232   : > { %1332 = vmatpush3.bf16.msra.mxu0 %v1417_v32  ;;  %1335 = vmatprep.mubr.msk.bf16.mxu0 %vm1495_vm3, %v1494_v33  ;;  %v666_v37 = vpack.c.bf16 %v661_v36, %v660_v35  ;;  %v737_v38 = vld [vmem:[%s1611_s20] sm:$0xf]  ;;  %v738_v40 = vld [vmem:[%s1611_s20 + $0x4] sm:$0xf] }
 0x233   : > { %1333 = vmatprep.subr.bf16.mxu0 %v1494_v33  ;;  %1341 = vmatprep.mubr.msk.bf16.mxu1 %vm1495_vm3, %v1494_v33  ;;  %v746_v39 = vsel %vm741_vm5, %v737_v38, 0  ;;  %v792_v41 = vsel %vm741_vm5, %v738_v40, 0  ;;  %v1282_v42 = vld [vmem:[%s1785_s30] ss:$0 sm:$0xff]  ;;  %v740_v11 = vld [vmem:[%s1617_s29 + $0x4] sm:$0xf] }
 0x234   : > { %1340 = vmatpush3.bf16.xpose.msra.mxu1 %v746_v39  ;;  %v739_v9 = vld [vmem:[%s1617_s29] sm:$0xf]  ;;  %v910_v12 = vsel %vm862_vm7, %v740_v11, 0  ;;  %v1015_v24 = vand.u32 127, %v1014_v22 }
 0x235   : > { %1351 = vmatprep.subr.bf16.mxu1 %v1494_v33  ;;  %v864_v10 = vsel %vm862_vm7, %v739_v9, 0  ;;  %v1419_v17 = vld [vmem:[%s549_s28] sm:$0xff]  }
 0x236   : > { %1334 = vmatpush3.bf16.msra.mxu0 %v1418_v34  ;;  %v1016_v25 = vld [vmem:[#allocation2] sm:$0xff]  ;;  %v1017_v26 = vld [vmem:[#allocation2 + $0x8] sm:$0xff]  ;;  %vm1019_vm8 = vcmp.eq.s32.totalorder %v1015_v24, %v1018_v23 }
 0x237   : > { %1345 = vmatprep.subr.bf16.mxu0 %v1494_v33  ;;  %v1290_v27 = vsel %vm1019_vm8, 1.0, %v1494_v33 }
 0x238   : > { %v1022_v28 = vmul.f32 %v1290_v27, %v1016_v25  ;;  %v1023_v29 = vmul.f32 %v1290_v27, %v1017_v26 }
 0x239   : > { %1336 = vmatmul.mubr.msk.bf16.vlgmr.msra.gmra.mrb[0].mxu0 %vm679_vm4, %v666_v37 }
 0x23a   : > { %1347 = vmatprep.mubr.msk.bf16.mxu0 %vm1495_vm3, %v1494_v33  ;;  %v1024_v30 = vsel %vm741_vm5, %v1022_v28, 0.0  ;;  %v1027_v31 = vsel %vm741_vm5, %v1023_v29, 0.0 }
 0x23f   : > { %1346 = vmatpush3.bf16.xpose.msra.mxu0 %v792_v41 }
 0x240   : > { %1357 = vmatprep.subr.bf16.mxu0 %v1494_v33 }
 0x30c   : > { %v717_v43 = vpop.f32.mrb[0].mxu0 }
 0x30d   : > { %v731_v44 = vadd.f32 %v1282_v42, %v717_v43  ;;  %v1337_v45 = vpop.f32.mrb[1].mxu0 }
 0x30e   : > { %v720_v46 = vpop.f32.mrb[2].mxu0 }
 0x30f   : > { %v733_v47 = vmul.f32 0.25, %v731_v44  ;;  %v732_v48 = vadd.f32 %v1282_v42, %v720_v46  ;;  %v1338_v49 = vpop.f32.mrb[3].mxu0  ;;  %v1030_v46 = vld [vmem:[#allocation3] sm:$0xff] }
 0x311   : > { %v735_v50 = vpack.c.bf16 %v733_v47, %v733_v47  ;;  %v734_v51 = vmul.f32 0.25, %v732_v48 }
 0x313   : > { %v736_v52 = vpack.c.bf16 %v734_v51, %v734_v51  ;;  %1342 = vmatmul.mubr.msk.bf16.vlgmr.msra.gmra.mrb[0].mxu1 %vm741_vm5, %v735_v50 }
 0x314   : > { %1353 = vmatprep.mubr.msk.bf16.mxu1 %vm1495_vm3, %v1494_v33  ;;  %1352 = vmatpush3.bf16.msra.mxu1 %v864_v10 }
 0x315   : > { %1348 = vmatmul.mubr.msk.bf16.vlgmr.msra.gmra.mrb[4].mxu0 %vm741_vm5, %v736_v52  ;;  %1363 = vmatprep.subr.bf16.mxu1 %v1494_v33  ;;  %v1031_v52 = vld [vmem:[#allocation3 + $0x8] sm:$0xff] }
 0x316   : > { %1359 = vmatprep.mubr.msk.bf16.mxu0 %vm1495_vm3, %v1494_v33  ;;  %1358 = vmatpush3.bf16.msra.mxu0 %v910_v12 }
 0x3e6   : > { %v782_v53 = vpop.f32.mrb[0].mxu1 }
 0x3e7   : > { %v1343_v54 = vpop.f32.mrb[1].mxu1  ;;  %v835_v55 = vsel %vm834_vm6, %v782_v53, -inf }
 0x3e8   : > { %836 = vmax.xlane.f32.xlu0 %v835_v55  ;;  %v785_v56 = vpop.f32.mrb[2].mxu1  ;;  %v828_v57 = vpop.f32.mrb[4].mxu0 }
 0x3e9   : > { %v1344_v58 = vpop.f32.mrb[3].mxu1  ;;  %v1349_v59 = vpop.f32.mrb[5].mxu0  ;;  %v838_v62 = vsel %vm834_vm6, %v828_v57, -inf }
 0x3ea   : > { %v831_v60 = vpop.f32.mrb[6].mxu0  ;;  %v1043_v58 = vld [vmem:[%s1770_s0] sm:$0xff] (%p1038_p6) }
 0x3eb   : > { %v1350_v61 = vpop.f32.mrb[7].mxu0  ;;  %v1292_v60 = vld [vmem:[%s1779_s9] ss:$0 sm:$0xff] (%p1038_p6) }
 0x3ec   : > { %839 = vmax.xlane.f32.xlu0 %v838_v62  ;;  %v1044_v62 = vld [vmem:[%s1770_s0 + $0x8] sm:$0xff] (%p1038_p6) }
 0x3f0   : > { %1025 = vadd.xlane.f32.xlu0 %v1024_v30 }
 0x475   : > { %v837_v63 = vpop.xlane.xlu0 %836 }
 0x476   : > { %v841_v0 = vsub.f32 %v782_v53, %v837_v63  ;;  %v1054_v63 = vmul.f32 (%p1038_p6), %v1292_v60, %v1043_v58 }
 0x478   : > { %v843_v1 = vmul.f32 1.442695, %v841_v0 }
 0x479   : > { %v840_v2 = vpop.xlane.xlu0 %839 }
 0x47a   : > { %1420 = vpow2.f32 %v843_v1  ;;  %v842_v3 = vsub.f32 %v828_v57, %v840_v2  ;;  %v1293_v57 = vld [vmem:[%s1780_s10] ss:$0 sm:$0xff] (%p1038_p6)  ;;  %v1055_v1 = vmul.f32 (%p1038_p6), %v1292_v60, %v1044_v62 }
 0x47c   : > { %v845_v4 = vmul.f32 1.442695, %v842_v3  ;;  %v1056_v3 = vsel (%p1038_p6), %vm679_vm4, %v1054_v63, 0.0 }
 0x47d   : > { %v1026_v43 = vpop.xlane.xlu0 %1025  ;;  %1057 = vadd.xlane.f32.xlu0 (%p1038_p6), %v1056_v3 }
 0x47e   : > { %1422 = vpow2.f32 %v845_v4 }
 0x484   : > { %v1421_v5 = vpop.eup %1420 }
 0x485   : > { %v847_v6 = vsel %vm834_vm6, %v1421_v5, 0.0 }
 0x486   : > { %848 = vadd.xlane.f32.xlu1 %v847_v6  ;;  %v1496_v6 = vmov (%p1038_p6), 0  }
 0x487   : > { %1428 = vset.pattern.permute.xlu0 (%p1038_p6), %v1496_v6  ;;  %1429 = vset.pattern.permute.xlu1 (%p1038_p6), %v1496_v6 }
 0x488   : > { %v1423_v7 = vpop.eup %1422 }
 0x489   : > { %v850_v8 = vsel %vm834_vm6, %v1423_v7, 0.0 }
 0x48a   : > { %851 = vadd.xlane.f32.xlu1 %v850_v8  ;;  %v1294_v8 = vld [vmem:[#allocation4] ss:$0 sm:$0xff] (%p1038_p6) }
 0x48e   : > { %1028 = vadd.xlane.f32.xlu1 %v1027_v31 }
 0x50a   : > { %v1058_v9 = vpop.xlane.xlu0 (%p1038_p6), %1057 }
 0x513   : > { %v849_v13 = vpop.xlane.xlu1 %848 }
 0x514   : > { %1424 = vrcp.f32 %v849_v13 }
 0x517   : > { %v852_v14 = vpop.xlane.xlu1 %851 }
 0x518   : > { %1426 = vrcp.f32 %v852_v14 }
 0x51b   : > { %v1029_v48 = vpop.xlane.xlu1 %1028 }
 0x51e   : > { %v1425_v15 = vpop.eup %1424 }
 0x51f   : > { %v855_v16 = vmul.f32 %v1425_v15, %v1421_v5  ;;  %v1059_v5 = vsel (%p1038_p6), %vm679_vm4, %v1055_v1, 0.0 }
 0x520   : > { %1060 = vadd.xlane.f32.xlu0 (%p1038_p6), %v1059_v5 }
 0x521   : > { %v857_v18 = vpack.c.bf16 %v855_v16, %v855_v16 }
 0x522   : > { %v1427_v19 = vpop.eup %1426 }
 0x523   : > { %v856_v20 = vmul.f32 %v1427_v19, %v1423_v7  ;;  %1354 = vmatmul.mubr.msk.bf16.vlgmr.msra.gmra.mrb[4].mxu1 %vm834_vm6, %v857_v18 }
 0x524   : > { %1364 = vmatpush3.bf16.msra.mxu1 %v1419_v17  ;;  %1365 = vmatprep.mubr.msk.bf16.mxu1 %vm1495_vm3, %v1494_v33  ;;  %v1289_v33 = vld [vmem:[%s552_s13] ss:$0 sm:$0xff] }
 0x525   : > { %v858_v21 = vpack.c.bf16 %v856_v20, %v856_v20 }
 0x527   : > { %1360 = vmatmul.mubr.msk.bf16.vlgmr.msra.gmra.mrb[8].mxu0 %vm834_vm6, %v858_v21 }
 0x5ad   : > { %v1061_v13 = vpop.xlane.xlu0 (%p1038_p6), %1060 }
 0x5f6   : > { %v900_v32 = vpop.f32.mrb[4].mxu1 }
 0x5f7   : > { %v1355_v34 = vpop.f32.mrb[5].mxu1 }
 0x5f8   : > { %v903_v35 = vpop.f32.mrb[6].mxu1 }
 0x5f9   : > { %v1356_v36 = vpop.f32.mrb[7].mxu1 }
 0x5fa   : > { %v946_v37 = vpop.f32.mrb[8].mxu0 }
 0x5fb   : > { %v954_v38 = vpack.c.bf16 %v946_v37, %v900_v32  ;;  %v1361_v39 = vpop.f32.mrb[9].mxu0 }
 0x5fc   : > { %v949_v40 = vpop.f32.mrb[10].mxu0 }
 0x5fd   : > { %v1362_v41 = vpop.f32.mrb[11].mxu0  ;;  %1366 = vmatmul.mubr.msk.bf16.vlgmr.msra.gmra.mrb[8].mxu1 %vm741_vm5, %v954_v38 }
 0x6d0   : > { %v998_v42 = vpop.f32.mrb[8].mxu1 }
 0x6d1   : > { %v1012_v44 = vadd.f32 %v1289_v33, %v998_v42  ;;  %v1367_v45 = vpop.f32.mrb[9].mxu1 }
 0x6d2   : > { %v1001_v47 = vpop.f32.mrb[10].mxu1 }
 0x6d3   : > { %v1032_v49 = vmul.f32 %v1026_v43, %v1012_v44  ;;  %v1013_v50 = vadd.f32 %v1289_v33, %v1001_v47  ;;  %v1368_v51 = vpop.f32.mrb[11].mxu1  ;;  %1042 = sbr.rel (!%p1038_p6) target bundleno = 2071 (0x817), region = 76 }
 0x6d5   : > { %v1034_v53 = vadd.f32 %v1032_v49, %v1030_v46  ;;  %v1033_v54 = vmul.f32 %v1029_v48, %v1013_v50 }
 0x6d7   : > { %1036 = vst.msk [vmem:[#allocation3] sm:$0xff] %vm679_vm4, %v1034_v53  ;;  %v1035_v55 = vadd.f32 %v1033_v54, %v1031_v52 }
 0x6d9   : > { %1037 = vst.msk [vmem:[#allocation3 + $0x8] sm:$0xff] %vm679_vm4, %v1035_v55 }
 0x6de   : > { %v1045_v56 = vld [vmem:[#allocation3] sm:$0xff] }
 0x6df   : > { %v1069_v59 = vmul.f32 %v1293_v57, %v1045_v56 }
 0x6e0   : > { %v1046_v61 = vld [vmem:[#allocation3 + $0x8] sm:$0xff] }
 0x6e1   : > { %v1070_v0 = vmul.f32 %v1293_v57, %v1046_v61  ;;  %v1071_v2 = vsel %vm679_vm4, %v1069_v59, 0.0 }
 0x6e2   : > { %1072 = vadd.xlane.f32.xlu1 %v1071_v2 }
 0x6e3   : > { %v1074_v4 = vsel %vm679_vm4, %v1070_v0, 0.0 }
 0x6e6   : > { %1075 = vadd.xlane.f32.xlu1 %v1074_v4 }
 0x76f   : > { %v1073_v7 = vpop.xlane.xlu1 %1072 }
 0x770   : > { %v1077_v10 = vadd.f32 %v1073_v7, %v1058_v9 }
 0x772   : > { %v1086_v11 = vadd.f32 %v1294_v8, %v1077_v10 }
 0x773   : > { %v1076_v12 = vpop.xlane.xlu1 %1075 }
 0x774   : > { %v1295_v14 = vmul.f32 -1.442695, %v1086_v11  ;;  %v1078_v15 = vadd.f32 %v1076_v12, %v1061_v13 }
 0x776   : > { %1430 = vpow2.f32 %v1295_v14  ;;  %v1087_v16 = vadd.f32 %v1294_v8, %v1078_v15 }
 0x778   : > { %v1296_v17 = vmul.f32 -1.442695, %v1087_v16 }
 0x77a   : > { %1432 = vpow2.f32 %v1296_v17 }
 0x780   : > { %v1431_v18 = vpop.eup %1430 }
 0x781   : > { %v1094_v19 = vadd.f32 1.0, %v1431_v18 }
 0x783   : > { %1434 = vrcp.f32 %v1094_v19 }
 0x784   : > { %v1433_v20 = vpop.eup %1432 }
 0x785   : > { %v1095_v21 = vadd.f32 1.0, %v1433_v20 }
 0x787   : > { %1436 = vrcp.f32 %v1095_v21 }
 0x78d   : > { %v1435_v22 = vpop.eup %1434 }
 0x78e   : > { %1102 = vperm.xlu0 %1428, %v1435_v22  }
 0x791   : > { %v1437_v23 = vpop.eup %1436 }
 0x792   : > { %1107 = vperm.xlu1 %1429, %v1437_v23  }
 0x80d   : > { %v1103_v24 = vpop.permute.xlu0 %1102 }
 0x80e   : > { %v1110_v25 = vmul.f32 %v1103_v24, %v1045_v56 }
 0x810   : > { %v1112_v26 = vadd.f32 %v1110_v25, %v1043_v58 }
 0x811   : > { %v1108_v27 = vpop.permute.xlu1 %1107 }
 0x812   : > { %1114 = vst.msk [vmem:[#allocation5] sm:$0xff] %vm679_vm4, %v1112_v26  ;;  %v1111_v28 = vmul.f32 %v1108_v27, %v1046_v61 }
 0x814   : > { %v1113_v29 = vadd.f32 %v1111_v28, %v1044_v62 }
 0x816   : > { %1115 = vst.msk [vmem:[#allocation5 + $0x8] sm:$0xff] %vm679_vm4, %v1113_v29 }
 0x817 PF: > { %s1786_s23 = sadd.s32 4294967295, %s1490_s25   ;;  %s1497_s16 = smov [#allocation5]  }
 0x818   : > { %p1735_p7 = scmp.eq.s32.totalorder %s1786_s23, 15  ;;  %s1124_s22 = sshll.u32 %s1497_s16, 4  ;;  %s1125_s22 = int_to_ptr.vmem [resolvable:$true] %s1124_s22 }
 0x819   : > { %s1438_s30 = scalar_lea.vmem %s1125_s22, 256  ;;  %p1445_p11 = scmp.lt.s32.totalorder %s1125_s22, %s1125_s22 }
 0x81a   : > { %p1439_p8 = scmp.ne.s32.totalorder %s1125_s22, %s1438_s30  ;;  %p1446_p12 = scmp.lt.s32.totalorder %s1438_s30, %s1438_s30 }
 0x81c   : > { %p1440_p9 = pnand %p1439_p8, %p1735_p7  ;;  %p1447_p13 = por %p1446_p12, %p1445_p11 }
 0x81e   : > { %p1441_p10 = pneg %p1440_p9 }
 0x820   : > { %p1448_p0 = pnand %p1447_p13, %p1441_p10 }
 0x822   : > { %1451 = shalt.err (!%p1448_p0)
}
 0x823   : > { %s1452_s17 = scalar_lea.hbm %s1782_s12, 256 }
 0x824   : > { %p1453_p1 = scmp.ne.s32.totalorder %s1782_s12, %s1452_s17  ;;  %p1458_p4 = scmp.lt.u32.totalorder %s1452_s17, %s1782_s12 }
 0x826   : > { %p1454_p2 = pnand %p1453_p1, %p1735_p7 }
 0x828   : > { %p1455_p3 = pneg %p1454_p2 }
 0x82a   : > { %p1460_p5 = pnand %p1458_p4, %p1455_p3 }
 0x82c   : > { %1463 = shalt.err (!%p1460_p5)
}
 0x82d   : > { %s1498_s3 = smov 128   ;;  %s1499_s15 = smov 8  }
 0x82e   : > { %1370 = dma.vmem_to_hbm [thread:$0]  (%p1735_p7), %s1125_s22, 256, %s1782_s12, [#allocation6], %s1498_s3, %s1498_s3, %s1499_s15  }
 0x82f   : > { %1477 = dma.done.wait (%p1735_p7), [#allocation6], 256  }
 0x830   : > { %1479 = vsyncadd (%p1735_p7), [#allocation6], 4294967040 }
 0x831 PF: > { %s25_s25 = sadd.s32 1, %s1490_s25   ;;  %s1788_s23 = smov %s1486_s24 }
 0x832   : > { %p22_p6 = scmp.ge.s32.totalorder %s25_s25, 18   ;;  %s1789_s24 = smov %s1791_s26 }
 0x834   :  { %24 = sbr.rel (!%p22_p6) target bundleno = 5 (0x5), region = 122 }
 0x83b   :  { %1140 = vsyncpa [#allocation6], 1 }
 0x83c   :  { %1142 = vsyncpa [#allocation6 + $0x1], 1 }

</bundles_post_ra>
